<compile_context>
chip_gen: v6e
topology: v6e:2x2x1
jax: 0.10.0
libtpu: 0.0.40
codegen_flags: <defaults>
</compile_context>

<pallas_src>
import functools
import math

import numpy as np
import jax
import jax.numpy as jnp
from jax import lax
from jax.experimental import pallas as pl
from jax.experimental.pallas import tpu as pltpu

_NEG = -1e30  # finite "minus infinity": exp(_NEG - m) underflows to exactly 0


# ---------------------------------------------------------------------------
# In-kernel helpers (operate on loaded VMEM values / refs)
# ---------------------------------------------------------------------------

def _linear(x, w_ref, b_ref):
    w = w_ref[...]
    if w.dtype != x.dtype:          # bf16 weights: cast activations for the MXU,
        x = x.astype(w.dtype)       # accumulate in f32 via preferred_element_type
    y = jnp.dot(x, w, preferred_element_type=jnp.float32)
    return y + b_ref[...]           # bias stays f32


def _mlp(x, wb_refs, act):
    """Stack of Linear layers; `act` after every layer except the last."""
    n = len(wb_refs) // 2
    for i in range(n):
        x = _linear(x, wb_refs[2 * i], wb_refs[2 * i + 1])
        if i < n - 1:
            x = act(x)
    return x


def _encode(x, hidden_refs, w_mu_ref, b_mu_ref, w_lv_ref, b_lv_ref):
    """Encoder trunk (Linear+Tanh per hidden layer) + split mu / logvar heads."""
    h = x
    for i in range(len(hidden_refs) // 2):
        h = jnp.tanh(_linear(h, hidden_refs[2 * i], hidden_refs[2 * i + 1]))
    return (_linear(h, w_mu_ref, b_mu_ref),
            _linear(h, w_lv_ref, b_lv_ref))


def _row_logsumexp(x):
    m = jnp.max(x, axis=-1, keepdims=True)
    return jnp.log(jnp.sum(jnp.exp(x - m), axis=-1, keepdims=True)) + m


# ---------------------------------------------------------------------------
# Fused kernels
# ---------------------------------------------------------------------------

def _dcpml_train_kernel(*refs, n_enc_hidden, n_dec, n_proj, batch,
                        n_items, n_items_pad, lmb):
    # ref layout: x_sup, x_que, eps_c, eps_t,
    #             enc_hidden(W,b)*, W_mu, b_mu, W_lv, b_lv,
    #             dec(W,b)* (last layer item-padded),
    #             proj(W,b)* (last layer scaled by 1/sqrt(temp)),
    #             logit_pad, losses(1,2)
    x_sup_ref, x_que_ref, eps_c_ref, eps_t_ref = refs[:4]
    idx = 4
    enc_hidden = refs[idx: idx + 2 * n_enc_hidden]; idx += 2 * n_enc_hidden
    w_mu_ref, b_mu_ref, w_lv_ref, b_lv_ref = refs[idx: idx + 4]; idx += 4
    dec_refs = refs[idx: idx + 2 * n_dec]; idx += 2 * n_dec
    proj_refs = refs[idx: idx + 2 * n_proj]; idx += 2 * n_proj
    logit_ref, losses_ref = refs[idx], refs[idx + 1]

    f32 = jnp.float32
    B = batch
    N = 2 * B

    # --- encoder per half (no stacked-input HBM concat), split mu/logvar heads ---
    x_sup = x_sup_ref[...]                                   # [B, n_items]
    x_que = x_que_ref[...]
    mu_c, lv_c = _encode(x_sup, enc_hidden, w_mu_ref, b_mu_ref, w_lv_ref, b_lv_ref)
    mu_t, lv_t = _encode(x_que, enc_hidden, w_mu_ref, b_mu_ref, w_lv_ref, b_lv_ref)
    z_c = mu_c + eps_c_ref[...] * jnp.exp(0.5 * lv_c)        # [B, z_dim]
    z_t = mu_t + eps_t_ref[...] * jnp.exp(0.5 * lv_t)        # [B, z_dim]

    # --- decoder on z_target; last layer is item-padded -> lane-dense store ---
    logit = _mlp(z_t, dec_refs, jnp.tanh)                    # [B, n_items_pad]
    logit_ref[...] = logit.astype(logit_ref.dtype)

    # --- multinomial NLL: padded logits carry bias=-1e30 so they vanish from lse ---
    lse = _row_logsumexp(logit)                              # [B, 1]
    log_sm = logit - lse                                     # [B, n_items_pad]
    if n_items_pad != n_items:
        log_sm = log_sm[:, :n_items]                         # static lane slice
    row_ll = jnp.sum(x_que * log_sm, axis=-1, keepdims=True)  # [B, 1]
    neg_ll = -jnp.sum(row_ll, axis=0, keepdims=True) / f32(B)  # (1, 1)

    # --- contrastive loss: projector on stacked z (tiny in-VMEM concat) ---
    z2 = jnp.concatenate([z_c, z_t], axis=0)                 # [N, z_dim]
    q = _mlp(z2, proj_refs, lambda v: jnp.maximum(v, 0.0))   # [N, z_dim]; 1/sqrt(temp) folded
    # sim = q q^T / temp (temperature already folded into q); contract last dims.
    sim = lax.dot_general(q, q, dimension_numbers=(((1,), (1,)), ((), ())),
                          preferred_element_type=f32)        # [N, N]
    row = lax.broadcasted_iota(jnp.int32, (N, N), 0)
    col = lax.broadcasted_iota(jnp.int32, (N, N), 1)
    sim_nd = jnp.where(row == col, f32(_NEG), sim)           # mask self-similarity only
    row_lse = _row_logsumexp(sim_nd)                         # [N, 1]

    # sum_i positive_i = 2 * sum_i <q_c_i, q_t_i>  (sim is symmetric) — no NxN select.
    pos_rows = jnp.sum(q[:B] * q[B:], axis=-1, keepdims=True)              # [B, 1]
    ce_sum = (jnp.sum(row_lse, axis=0, keepdims=True)
              - 2.0 * jnp.sum(pos_rows, axis=0, keepdims=True))            # (1, 1)
    loss_con = (lmb / f32(N)) * ce_sum                                     # (1, 1)

    # --- single merged (1, 2) loss output: [neg_ll, lambda * loss_con] ---
    lane = lax.broadcasted_iota(jnp.int32, (1, 2), 1)
    losses_ref[...] = jnp.where(lane == 0, neg_ll, loss_con)


def _dcpml_eval_kernel(*refs, n_enc_hidden, n_dec):
    # Eval matches the PyTorch eval branch exactly: it DOES apply the
    # reparameterization noise before decoding.
    x_ref, eps_ref = refs[:2]
    idx = 2
    enc_hidden = refs[idx: idx + 2 * n_enc_hidden]; idx += 2 * n_enc_hidden
    w_mu_ref, b_mu_ref, w_lv_ref, b_lv_ref = refs[idx: idx + 4]; idx += 4
    dec_refs = refs[idx: idx + 2 * n_dec]; idx += 2 * n_dec
    logit_ref = refs[idx]

    mu, lv = _encode(x_ref[...], enc_hidden, w_mu_ref, b_mu_ref, w_lv_ref, b_lv_ref)
    z = mu + eps_ref[...] * jnp.exp(0.5 * lv)
    logit_ref[...] = _mlp(z, dec_refs, jnp.tanh).astype(logit_ref.dtype)


# ---------------------------------------------------------------------------
# Host-side parameter prep (one-time, outside jit) + pallas_call wrappers
# ---------------------------------------------------------------------------

def _round_up(x, m):
    return ((x + m - 1) // m) * m


def _spec(shape):
    return pl.BlockSpec(shape, lambda i: (0,) * len(shape))


def prepare_dcpml_params(params, *, z_dim, n_items, temp, use_bf16=False):
    """Split the encoder head, item-pad the decoder output layer, fold 1/temp
    into the projector, optionally cast matmul weights to bf16. Host-side,
    once; the jitted forward only streams the final arrays."""
    P = _round_up(n_items, 128)
    wdt = jnp.bfloat16 if use_bf16 else jnp.float32

    def w(a, dt=None):
        return jnp.asarray(a, dt if dt is not None else wdt)

    def b(a):
        return jnp.asarray(a, jnp.float32).reshape(1, -1)

    enc, dec, proj = params["enc"], params["dec"], params["proj"]

    enc_flat = []
    for (W, bb) in enc[:-1]:
        enc_flat += [w(W), b(bb)]
    W_h, b_h = enc[-1]                                   # [h, 2z], [2z]
    enc_flat += [w(W_h[:, :z_dim]), b(b_h[:z_dim]),
                 w(W_h[:, z_dim:]), b(b_h[z_dim:])]

    dec_flat = []
    for (W, bb) in dec[:-1]:
        dec_flat += [w(W), b(bb)]
    W_d, b_d = dec[-1]                                   # [h, n_items], [n_items]
    pad = P - n_items
    W_dp = jnp.pad(jnp.asarray(W_d, jnp.float32), ((0, 0), (0, pad)))
    b_dp = jnp.pad(jnp.asarray(b_d, jnp.float32), ((0, pad),), constant_values=_NEG)
    dec_flat += [w(W_dp), b(b_dp)]

    s = 1.0 / math.sqrt(float(temp))                     # sim = (s*q)(s*q)^T = q q^T / temp
    proj_flat = []
    for i, (W, bb) in enumerate(proj):
        if i == len(proj) - 1:
            W = jnp.asarray(W, jnp.float32) * s
            bb = jnp.asarray(bb, jnp.float32) * s
        proj_flat += [w(W, jnp.float32), b(bb)]          # projector stays f32

    weights = (tuple(enc_flat), tuple(dec_flat), tuple(proj_flat))
    meta = dict(n_enc_hidden=len(enc) - 1, n_dec=len(dec), n_proj=len(proj),
                n_items=n_items, n_items_pad=P)
    return weights, meta


def dcpml_forward(weights, input_sup, input_que, eps_c, eps_t, *,
                  meta, lmb, training):
    enc_flat, dec_flat, proj_flat = weights
    B, n_items = input_sup.shape
    assert n_items == meta["n_items"]
    # TODO(synk): pad the batch if it is ever not a multiple of the f32 sublane tile.
    assert B % 8 == 0, "batch must be a multiple of 8 (f32 sublane tile)"
    P = meta["n_items_pad"]

    cparams = pltpu.CompilerParams(
        dimension_semantics=("arbitrary",),
        vmem_limit_bytes=32 * 1024 * 1024,   # raise toward physical VMEM when scaling
    )

    if training:
        inputs = [input_sup, input_que, eps_c, eps_t] + list(enc_flat) \
                 + list(dec_flat) + list(proj_flat)
        kernel = functools.partial(
            _dcpml_train_kernel,
            n_enc_hidden=meta["n_enc_hidden"], n_dec=meta["n_dec"],
            n_proj=meta["n_proj"], batch=B, n_items=n_items, n_items_pad=P,
            lmb=float(lmb))
        logit_pad, losses = pl.pallas_call(
            kernel,
            grid=(1,),
            out_shape=(jax.ShapeDtypeStruct((B, P), jnp.float32),
                       jax.ShapeDtypeStruct((1, 2), jnp.float32)),
            in_specs=[_spec(a.shape) for a in inputs],
            out_specs=(_spec((B, P)), _spec((1, 2))),
            compiler_params=cparams,
        )(*inputs)
        logit = logit_pad if P == n_items else logit_pad[:, :n_items]
        neg_ll = losses[0, 0]
        loss_con = losses[0, 1]
        return logit, neg_ll, loss_con, neg_ll + loss_con

    else:
        inputs = [input_sup, eps_c] + list(enc_flat) + list(dec_flat)
        kernel = functools.partial(
            _dcpml_eval_kernel,
            n_enc_hidden=meta["n_enc_hidden"], n_dec=meta["n_dec"])
        logit_pad = pl.pallas_call(
            kernel,
            grid=(1,),
            out_shape=jax.ShapeDtypeStruct((B, P), jnp.float32),
            in_specs=[_spec(a.shape) for a in inputs],
            out_specs=_spec((B, P)),
            compiler_params=cparams,
        )(*inputs)
        logit = logit_pad if P == n_items else logit_pad[:, :n_items]
        return logit, None, None, None


# ---------------------------------------------------------------------------
# Pure-JAX reference (mirrors the PyTorch forward) for correctness check
# ---------------------------------------------------------------------------

def _ref_mlp(x, layers, act):
    n = len(layers)
    for i, (W, b) in enumerate(layers):
        x = x @ W + b
        if i < n - 1:
            x = act(x)
    return x


def _neg_mask_flat_indices(N):
    mask = np.ones((N, N), dtype=bool)
    np.fill_diagonal(mask, False)
    for i in range(N // 2):
        mask[i, N // 2 + i] = False
        mask[N // 2 + i, i] = False
    return np.nonzero(mask.reshape(-1))[0]


def dcpml_reference(params, input_sup, input_que, eps_c, eps_t, *, z_dim, temp, lmb):
    h_c = _ref_mlp(input_sup, params["enc"], jnp.tanh)
    h_t = _ref_mlp(input_que, params["enc"], jnp.tanh)
    z_c = h_c[:, :z_dim] + eps_c * jnp.exp(0.5 * h_c[:, z_dim:])
    z_t = h_t[:, :z_dim] + eps_t * jnp.exp(0.5 * h_t[:, z_dim:])
    logit = _ref_mlp(z_t, params["dec"], jnp.tanh)
    neg_ll = -jnp.mean(jnp.sum(input_que * jax.nn.log_softmax(logit, axis=-1), axis=-1))

    g_c = _ref_mlp(z_c, params["proj"], jax.nn.relu)
    g_t = _ref_mlp(z_t, params["proj"], jax.nn.relu)
    B = input_sup.shape[0]
    N = 2 * B
    q = jnp.concatenate([g_c, g_t], axis=0)
    sim = (q @ q.T) / temp
    sim_i_j = jnp.diagonal(sim, offset=B)
    positive = jnp.concatenate([sim_i_j, sim_i_j]).reshape(N, 1)
    negative = jnp.take(sim.reshape(-1),
                        jnp.asarray(_neg_mask_flat_indices(N))).reshape(N, N - 2)
    logits = jnp.concatenate([positive, negative], axis=1)
    ce = jax.nn.logsumexp(logits, axis=-1) - logits[:, 0]
    loss_con = lmb * jnp.sum(ce) / N
    return logit, neg_ll, loss_con, neg_ll + loss_con


# ---------------------------------------------------------------------------
# Parameter construction (deterministic, synthetic)
# ---------------------------------------------------------------------------

def xavier_normal(key, fan_in, fan_out):
    std = math.sqrt(2.0 / (fan_in + fan_out))
    return std * jax.random.normal(key, (fan_in, fan_out), jnp.float32)


def trunc_bias(key, n, std=0.001):
    return std * jax.random.truncated_normal(key, -2.0, 2.0, (n,), jnp.float32)


def make_mlp_params(key, dims, std_bias=0.001):
    layers = []
    for i in range(len(dims) - 1):
        key, kw, kb = jax.random.split(key, 3)
        layers.append((xavier_normal(kw, dims[i], dims[i + 1]),
                       trunc_bias(kb, dims[i + 1], std_bias)))
    return layers


# ---------------------------------------------------------------------------
# Main
# ---------------------------------------------------------------------------

if __name__ == "__main__":
    opt = {"z_dim": 16, "enc_dim": [32], "dec_dim": [32],
           "batch_size": 8, "lambda": 0.5, "temp": 0.5}
    n_items = 64
    batch = opt["batch_size"]
    z_dim = opt["z_dim"]

    root = jax.random.PRNGKey(0)
    k_enc, k_dec, k_proj, k_sup, k_que, k_eps_c, k_eps_t = jax.random.split(root, 7)

    params = {
        "enc": make_mlp_params(k_enc, [n_items] + opt["enc_dim"] + [2 * z_dim]),
        "dec": make_mlp_params(k_dec, [z_dim] + opt["dec_dim"] + [n_items]),
        "proj": make_mlp_params(k_proj, [z_dim, z_dim, z_dim]),
    }

    input_sup = (jax.random.uniform(k_sup, (batch, n_items)) < 0.2).astype(jnp.float32)
    input_que = (jax.random.uniform(k_que, (batch, n_items)) < 0.2).astype(jnp.float32)
    eps_c = jax.random.normal(k_eps_c, (batch, z_dim), jnp.float32)
    eps_t = jax.random.normal(k_eps_t, (batch, z_dim), jnp.float32)

    # One-time weight prep (split mu/logvar head, item-pad decoder, fold 1/temp).
    # use_bf16=True halves weight bytes / doubles MXU rate on v6e/v7x; kept off so
    # the f32 reference comparison below stays at 1e-3 tolerance.
    weights, meta = prepare_dcpml_params(
        params, z_dim=z_dim, n_items=n_items, temp=opt["temp"], use_bf16=False)

    # --- training path: single fused Pallas kernel ---
    fwd = jax.jit(functools.partial(
        dcpml_forward, meta=meta, lmb=opt["lambda"], training=True))
    logit, neg_ll, loss_con, loss = fwd(weights, input_sup, input_que, eps_c, eps_t)
    jax.block_until_ready((logit, neg_ll, loss_con, loss))

    assert logit.shape == (batch, n_items)
    assert bool(jnp.isfinite(loss))

    # correctness vs pure-JAX reference of the PyTorch forward
    r_logit, r_negll, r_losscon, r_loss = dcpml_reference(
        params, input_sup, input_que, eps_c, eps_t,
        z_dim=z_dim, temp=opt["temp"], lmb=opt["lambda"])
    assert jnp.allclose(logit, r_logit, rtol=1e-3, atol=1e-3)
    assert jnp.allclose(neg_ll, r_negll, rtol=1e-3, atol=1e-3)
    assert jnp.allclose(loss_con, r_losscon, rtol=1e-3, atol=1e-3)
    assert jnp.allclose(loss, r_loss, rtol=1e-3, atol=1e-3)

    # --- eval path: fused encoder+reparam+decoder kernel, losses are None ---
    fwd_eval = jax.jit(functools.partial(
        dcpml_forward, meta=meta, lmb=opt["lambda"], training=False))
    logit_eval, _, _, _ = fwd_eval(weights, input_sup, input_que, eps_c, eps_t)
    jax.block_until_ready(logit_eval)
    assert logit_eval.shape == (batch, n_items)

    h_eval = _ref_mlp(input_sup, params["enc"], jnp.tanh)
    z_eval = h_eval[:, :z_dim] + eps_c * jnp.exp(0.5 * h_eval[:, z_dim:])
    r_logit_eval = _ref_mlp(z_eval, params["dec"], jnp.tanh)
    assert jnp.allclose(logit_eval, r_logit_eval, rtol=1e-3, atol=1e-3)

    print("KERNEL_OK")
</pallas_src>

<mosaic_0001>
module attributes {stable_mosaic.version = 11 : i64} {
  func.func @_dcpml_train_kernel(%arg0: i32, %arg1: memref<8x64xf32, #tpu.memory_space<vmem>>, %arg2: memref<8x64xf32, #tpu.memory_space<vmem>>, %arg3: memref<8x16xf32, #tpu.memory_space<vmem>>, %arg4: memref<8x16xf32, #tpu.memory_space<vmem>>, %arg5: memref<64x32xf32, #tpu.memory_space<vmem>>, %arg6: memref<1x32xf32, #tpu.memory_space<vmem>>, %arg7: memref<32x16xf32, #tpu.memory_space<vmem>>, %arg8: memref<1x16xf32, #tpu.memory_space<vmem>>, %arg9: memref<32x16xf32, #tpu.memory_space<vmem>>, %arg10: memref<1x16xf32, #tpu.memory_space<vmem>>, %arg11: memref<16x32xf32, #tpu.memory_space<vmem>>, %arg12: memref<1x32xf32, #tpu.memory_space<vmem>>, %arg13: memref<32x128xf32, #tpu.memory_space<vmem>>, %arg14: memref<1x128xf32, #tpu.memory_space<vmem>>, %arg15: memref<16x16xf32, #tpu.memory_space<vmem>>, %arg16: memref<1x16xf32, #tpu.memory_space<vmem>>, %arg17: memref<16x16xf32, #tpu.memory_space<vmem>>, %arg18: memref<1x16xf32, #tpu.memory_space<vmem>>, %arg19: memref<8x128xf32, #tpu.memory_space<vmem>>, %arg20: memref<1x2xf32, #tpu.memory_space<vmem>>) attributes {dimension_semantics = [#tpu.dimension_semantics<arbitrary>], iteration_bounds = array<i64: 1>, scalar_prefetch = 0 : i64, scratch_operands = 0 : i64, tpu.core_type = #tpu.core_type<tc>, window_params = [{pipeline_mode = #tpu.pipeline_mode<synchronous>, transform_indices = @transform_0, window_bounds = array<i64: 8, 64>}, {pipeline_mode = #tpu.pipeline_mode<synchronous>, transform_indices = @transform_1, window_bounds = array<i64: 8, 64>}, {pipeline_mode = #tpu.pipeline_mode<synchronous>, transform_indices = @transform_2, window_bounds = array<i64: 8, 16>}, {pipeline_mode = #tpu.pipeline_mode<synchronous>, transform_indices = @transform_3, window_bounds = array<i64: 8, 16>}, {pipeline_mode = #tpu.pipeline_mode<synchronous>, transform_indices = @transform_4, window_bounds = array<i64: 64, 32>}, {pipeline_mode = #tpu.pipeline_mode<synchronous>, transform_indices = @transform_5, window_bounds = array<i64: 1, 32>}, {pipeline_mode = #tpu.pipeline_mode<synchronous>, transform_indices = @transform_6, window_bounds = array<i64: 32, 16>}, {pipeline_mode = #tpu.pipeline_mode<synchronous>, transform_indices = @transform_7, window_bounds = array<i64: 1, 16>}, {pipeline_mode = #tpu.pipeline_mode<synchronous>, transform_indices = @transform_8, window_bounds = array<i64: 32, 16>}, {pipeline_mode = #tpu.pipeline_mode<synchronous>, transform_indices = @transform_9, window_bounds = array<i64: 1, 16>}, {pipeline_mode = #tpu.pipeline_mode<synchronous>, transform_indices = @transform_10, window_bounds = array<i64: 16, 32>}, {pipeline_mode = #tpu.pipeline_mode<synchronous>, transform_indices = @transform_11, window_bounds = array<i64: 1, 32>}, {pipeline_mode = #tpu.pipeline_mode<synchronous>, transform_indices = @transform_12, window_bounds = array<i64: 32, 128>}, {pipeline_mode = #tpu.pipeline_mode<synchronous>, transform_indices = @transform_13, window_bounds = array<i64: 1, 128>}, {pipeline_mode = #tpu.pipeline_mode<synchronous>, transform_indices = @transform_14, window_bounds = array<i64: 16, 16>}, {pipeline_mode = #tpu.pipeline_mode<synchronous>, transform_indices = @transform_15, window_bounds = array<i64: 1, 16>}, {pipeline_mode = #tpu.pipeline_mode<synchronous>, transform_indices = @transform_16, window_bounds = array<i64: 16, 16>}, {pipeline_mode = #tpu.pipeline_mode<synchronous>, transform_indices = @transform_17, window_bounds = array<i64: 1, 16>}, {pipeline_mode = #tpu.pipeline_mode<synchronous>, transform_indices = @transform_18, window_bounds = array<i64: 8, 128>}, {pipeline_mode = #tpu.pipeline_mode<synchronous>, transform_indices = @transform_19, window_bounds = array<i64: 1, 2>}]} {
    %c0 = arith.constant 0 : index
    %c0_0 = arith.constant 0 : index
    %0 = vector.load %arg1[%c0, %c0_0] : memref<8x64xf32, #tpu.memory_space<vmem>>, vector<8x64xf32>
    %c0_1 = arith.constant 0 : index
    %c0_2 = arith.constant 0 : index
    %1 = vector.load %arg2[%c0_1, %c0_2] : memref<8x64xf32, #tpu.memory_space<vmem>>, vector<8x64xf32>
    %c0_3 = arith.constant 0 : index
    %c0_4 = arith.constant 0 : index
    %2 = vector.load %arg5[%c0_3, %c0_4] : memref<64x32xf32, #tpu.memory_space<vmem>>, vector<64x32xf32>
    %cst = arith.constant dense<0.000000e+00> : vector<8x32xf32>
    %3 = tpu.matmul %0, %2, %cst {dimension_numbers = #tpu.dot_dimension_numbers<[1], [0], [0], [1], [0, 0, 1, 1], [], []>} : vector<8x64xf32>, vector<64x32xf32>, vector<8x32xf32> -> vector<8x32xf32>
    %c0_5 = arith.constant 0 : index
    %c0_6 = arith.constant 0 : index
    %4 = vector.load %arg6[%c0_5, %c0_6] : memref<1x32xf32, #tpu.memory_space<vmem>>, vector<1x32xf32>
    %5 = vector.broadcast %4 : vector<1x32xf32> to vector<8x32xf32>
    %6 = arith.addf %3, %5 : vector<8x32xf32>
    %7 = math.tanh %6 : vector<8x32xf32>
    %c0_7 = arith.constant 0 : index
    %c0_8 = arith.constant 0 : index
    %8 = vector.load %arg7[%c0_7, %c0_8] : memref<32x16xf32, #tpu.memory_space<vmem>>, vector<32x16xf32>
    %cst_9 = arith.constant dense<0.000000e+00> : vector<8x16xf32>
    %9 = tpu.matmul %7, %8, %cst_9 {dimension_numbers = #tpu.dot_dimension_numbers<[1], [0], [0], [1], [0, 0, 1, 1], [], []>} : vector<8x32xf32>, vector<32x16xf32>, vector<8x16xf32> -> vector<8x16xf32>
    %c0_10 = arith.constant 0 : index
    %c0_11 = arith.constant 0 : index
    %10 = vector.load %arg8[%c0_10, %c0_11] : memref<1x16xf32, #tpu.memory_space<vmem>>, vector<1x16xf32>
    %11 = vector.broadcast %10 : vector<1x16xf32> to vector<8x16xf32>
    %12 = arith.addf %9, %11 : vector<8x16xf32>
    %c0_12 = arith.constant 0 : index
    %c0_13 = arith.constant 0 : index
    %13 = vector.load %arg9[%c0_12, %c0_13] : memref<32x16xf32, #tpu.memory_space<vmem>>, vector<32x16xf32>
    %cst_14 = arith.constant dense<0.000000e+00> : vector<8x16xf32>
    %14 = tpu.matmul %7, %13, %cst_14 {dimension_numbers = #tpu.dot_dimension_numbers<[1], [0], [0], [1], [0, 0, 1, 1], [], []>} : vector<8x32xf32>, vector<32x16xf32>, vector<8x16xf32> -> vector<8x16xf32>
    %c0_15 = arith.constant 0 : index
    %c0_16 = arith.constant 0 : index
    %15 = vector.load %arg10[%c0_15, %c0_16] : memref<1x16xf32, #tpu.memory_space<vmem>>, vector<1x16xf32>
    %16 = vector.broadcast %15 : vector<1x16xf32> to vector<8x16xf32>
    %17 = arith.addf %14, %16 : vector<8x16xf32>
    %c0_17 = arith.constant 0 : index
    %c0_18 = arith.constant 0 : index
    %18 = vector.load %arg5[%c0_17, %c0_18] : memref<64x32xf32, #tpu.memory_space<vmem>>, vector<64x32xf32>
    %cst_19 = arith.constant dense<0.000000e+00> : vector<8x32xf32>
    %19 = tpu.matmul %1, %18, %cst_19 {dimension_numbers = #tpu.dot_dimension_numbers<[1], [0], [0], [1], [0, 0, 1, 1], [], []>} : vector<8x64xf32>, vector<64x32xf32>, vector<8x32xf32> -> vector<8x32xf32>
    %c0_20 = arith.constant 0 : index
    %c0_21 = arith.constant 0 : index
    %20 = vector.load %arg6[%c0_20, %c0_21] : memref<1x32xf32, #tpu.memory_space<vmem>>, vector<1x32xf32>
    %21 = vector.broadcast %20 : vector<1x32xf32> to vector<8x32xf32>
    %22 = arith.addf %19, %21 : vector<8x32xf32>
    %23 = math.tanh %22 : vector<8x32xf32>
    %c0_22 = arith.constant 0 : index
    %c0_23 = arith.constant 0 : index
    %24 = vector.load %arg7[%c0_22, %c0_23] : memref<32x16xf32, #tpu.memory_space<vmem>>, vector<32x16xf32>
    %cst_24 = arith.constant dense<0.000000e+00> : vector<8x16xf32>
    %25 = tpu.matmul %23, %24, %cst_24 {dimension_numbers = #tpu.dot_dimension_numbers<[1], [0], [0], [1], [0, 0, 1, 1], [], []>} : vector<8x32xf32>, vector<32x16xf32>, vector<8x16xf32> -> vector<8x16xf32>
    %c0_25 = arith.constant 0 : index
    %c0_26 = arith.constant 0 : index
    %26 = vector.load %arg8[%c0_25, %c0_26] : memref<1x16xf32, #tpu.memory_space<vmem>>, vector<1x16xf32>
    %27 = vector.broadcast %26 : vector<1x16xf32> to vector<8x16xf32>
    %28 = arith.addf %25, %27 : vector<8x16xf32>
    %c0_27 = arith.constant 0 : index
    %c0_28 = arith.constant 0 : index
    %29 = vector.load %arg9[%c0_27, %c0_28] : memref<32x16xf32, #tpu.memory_space<vmem>>, vector<32x16xf32>
    %cst_29 = arith.constant dense<0.000000e+00> : vector<8x16xf32>
    %30 = tpu.matmul %23, %29, %cst_29 {dimension_numbers = #tpu.dot_dimension_numbers<[1], [0], [0], [1], [0, 0, 1, 1], [], []>} : vector<8x32xf32>, vector<32x16xf32>, vector<8x16xf32> -> vector<8x16xf32>
    %c0_30 = arith.constant 0 : index
    %c0_31 = arith.constant 0 : index
    %31 = vector.load %arg10[%c0_30, %c0_31] : memref<1x16xf32, #tpu.memory_space<vmem>>, vector<1x16xf32>
    %32 = vector.broadcast %31 : vector<1x16xf32> to vector<8x16xf32>
    %33 = arith.addf %30, %32 : vector<8x16xf32>
    %c0_32 = arith.constant 0 : index
    %c0_33 = arith.constant 0 : index
    %34 = vector.load %arg3[%c0_32, %c0_33] : memref<8x16xf32, #tpu.memory_space<vmem>>, vector<8x16xf32>
    %cst_34 = arith.constant 5.000000e-01 : f32
    %35 = vector.broadcast %cst_34 : f32 to vector<8x16xf32>
    %36 = arith.mulf %35, %17 : vector<8x16xf32>
    %37 = math.exp %36 : vector<8x16xf32>
    %38 = arith.mulf %34, %37 : vector<8x16xf32>
    %39 = arith.addf %12, %38 : vector<8x16xf32>
    %c0_35 = arith.constant 0 : index
    %c0_36 = arith.constant 0 : index
    %40 = vector.load %arg4[%c0_35, %c0_36] : memref<8x16xf32, #tpu.memory_space<vmem>>, vector<8x16xf32>
    %cst_37 = arith.constant 5.000000e-01 : f32
    %41 = vector.broadcast %cst_37 : f32 to vector<8x16xf32>
    %42 = arith.mulf %41, %33 : vector<8x16xf32>
    %43 = math.exp %42 : vector<8x16xf32>
    %44 = arith.mulf %40, %43 : vector<8x16xf32>
    %45 = arith.addf %28, %44 : vector<8x16xf32>
    %c0_38 = arith.constant 0 : index
    %c0_39 = arith.constant 0 : index
    %46 = vector.load %arg11[%c0_38, %c0_39] : memref<16x32xf32, #tpu.memory_space<vmem>>, vector<16x32xf32>
    %cst_40 = arith.constant dense<0.000000e+00> : vector<8x32xf32>
    %47 = tpu.matmul %45, %46, %cst_40 {dimension_numbers = #tpu.dot_dimension_numbers<[1], [0], [0], [1], [0, 0, 1, 1], [], []>} : vector<8x16xf32>, vector<16x32xf32>, vector<8x32xf32> -> vector<8x32xf32>
    %c0_41 = arith.constant 0 : index
    %c0_42 = arith.constant 0 : index
    %48 = vector.load %arg12[%c0_41, %c0_42] : memref<1x32xf32, #tpu.memory_space<vmem>>, vector<1x32xf32>
    %49 = vector.broadcast %48 : vector<1x32xf32> to vector<8x32xf32>
    %50 = arith.addf %47, %49 : vector<8x32xf32>
    %51 = math.tanh %50 : vector<8x32xf32>
    %c0_43 = arith.constant 0 : index
    %c0_44 = arith.constant 0 : index
    %52 = vector.load %arg13[%c0_43, %c0_44] : memref<32x128xf32, #tpu.memory_space<vmem>>, vector<32x128xf32>
    %cst_45 = arith.constant dense<0.000000e+00> : vector<8x128xf32>
    %53 = tpu.matmul %51, %52, %cst_45 {dimension_numbers = #tpu.dot_dimension_numbers<[1], [0], [0], [1], [0, 0, 1, 1], [], []>} : vector<8x32xf32>, vector<32x128xf32>, vector<8x128xf32> -> vector<8x128xf32>
    %c0_46 = arith.constant 0 : index
    %c0_47 = arith.constant 0 : index
    %54 = vector.load %arg14[%c0_46, %c0_47] : memref<1x128xf32, #tpu.memory_space<vmem>>, vector<1x128xf32>
    %55 = vector.broadcast %54 : vector<1x128xf32> to vector<8x128xf32>
    %56 = arith.addf %53, %55 : vector<8x128xf32>
    %c0_48 = arith.constant 0 : index
    %c0_49 = arith.constant 0 : index
    %57 = vector.load %arg19[%c0_48, %c0_49] : memref<8x128xf32, #tpu.memory_space<vmem>>, vector<8x128xf32>
    tpu.vector_store %arg19[%c0_48, %c0_49], %56 {strides = array<i32>} : memref<8x128xf32, #tpu.memory_space<vmem>>, vector<8x128xf32>,
    %cst_50 = arith.constant dense<0xFF800000> : vector<8xf32>
    %58 = vector.multi_reduction <maximumf>, %56, %cst_50 [1] : vector<8x128xf32> to vector<8xf32>
    %59 = vector.shape_cast %58 : vector<8xf32> to vector<8x1xf32>
    %60 = vector.broadcast %59 : vector<8x1xf32> to vector<8x128xf32>
    %61 = arith.subf %56, %60 : vector<8x128xf32>
    %62 = math.exp %61 : vector<8x128xf32>
    %cst_51 = arith.constant dense<0.000000e+00> : vector<8xf32>
    %63 = vector.multi_reduction <add>, %62, %cst_51 [1] : vector<8x128xf32> to vector<8xf32>
    %64 = vector.shape_cast %63 : vector<8xf32> to vector<8x1xf32>
    %65 = math.log %64 : vector<8x1xf32>
    %66 = arith.addf %65, %59 : vector<8x1xf32>
    %67 = vector.broadcast %66 : vector<8x1xf32> to vector<8x128xf32>
    %68 = arith.subf %56, %67 : vector<8x128xf32>
    %69 = vector.extract_strided_slice %68 {offsets = [0, 0], sizes = [8, 64], strides = [1, 1]} : vector<8x128xf32> to vector<8x64xf32>
    %70 = arith.mulf %1, %69 : vector<8x64xf32>
    %cst_52 = arith.constant dense<0.000000e+00> : vector<8xf32>
    %71 = vector.multi_reduction <add>, %70, %cst_52 [1] : vector<8x64xf32> to vector<8xf32>
    %72 = vector.shape_cast %71 : vector<8xf32> to vector<8x1xf32>
    %cst_53 = arith.constant dense<0.000000e+00> : vector<1xf32>
    %73 = vector.multi_reduction <add>, %72, %cst_53 [0] : vector<8x1xf32> to vector<1xf32>
    %74 = vector.shape_cast %73 : vector<1xf32> to vector<1x1xf32>
    %cst_54 = arith.constant 0.000000e+00 : f32
    %75 = vector.broadcast %cst_54 : f32 to vector<1x1xf32>
    %76 = arith.subf %75, %74 : vector<1x1xf32>
    %cst_55 = arith.constant 8.000000e+00 : f32
    %77 = vector.broadcast %cst_55 : f32 to vector<1x1xf32>
    %78 = arith.divf %76, %77 : vector<1x1xf32>
    %79 = tpu.concatenate %39, %45 in 0 : vector<8x16xf32>, vector<8x16xf32> -> vector<16x16xf32>
    %c0_56 = arith.constant 0 : index
    %c0_57 = arith.constant 0 : index
    %80 = vector.load %arg15[%c0_56, %c0_57] : memref<16x16xf32, #tpu.memory_space<vmem>>, vector<16x16xf32>
    %cst_58 = arith.constant dense<0.000000e+00> : vector<16x16xf32>
    %81 = tpu.matmul %79, %80, %cst_58 {dimension_numbers = #tpu.dot_dimension_numbers<[1], [0], [0], [1], [0, 0, 1, 1], [], []>} : vector<16x16xf32>, vector<16x16xf32>, vector<16x16xf32> -> vector<16x16xf32>
    %c0_59 = arith.constant 0 : index
    %c0_60 = arith.constant 0 : index
    %82 = vector.load %arg16[%c0_59, %c0_60] : memref<1x16xf32, #tpu.memory_space<vmem>>, vector<1x16xf32>
    %83 = vector.broadcast %82 : vector<1x16xf32> to vector<16x16xf32>
    %84 = arith.addf %81, %83 : vector<16x16xf32>
    %cst_61 = arith.constant 0.000000e+00 : f32
    %85 = vector.broadcast %cst_61 : f32 to vector<16x16xf32>
    %86 = arith.maximumf %84, %85 : vector<16x16xf32>
    %c0_62 = arith.constant 0 : index
    %c0_63 = arith.constant 0 : index
    %87 = vector.load %arg17[%c0_62, %c0_63] : memref<16x16xf32, #tpu.memory_space<vmem>>, vector<16x16xf32>
    %cst_64 = arith.constant dense<0.000000e+00> : vector<16x16xf32>
    %88 = tpu.matmul %86, %87, %cst_64 {dimension_numbers = #tpu.dot_dimension_numbers<[1], [0], [0], [1], [0, 0, 1, 1], [], []>} : vector<16x16xf32>, vector<16x16xf32>, vector<16x16xf32> -> vector<16x16xf32>
    %c0_65 = arith.constant 0 : index
    %c0_66 = arith.constant 0 : index
    %89 = vector.load %arg18[%c0_65, %c0_66] : memref<1x16xf32, #tpu.memory_space<vmem>>, vector<1x16xf32>
    %90 = vector.broadcast %89 : vector<1x16xf32> to vector<16x16xf32>
    %91 = arith.addf %88, %90 : vector<16x16xf32>
    %cst_67 = arith.constant dense<0.000000e+00> : vector<16x16xf32>
    %92 = tpu.matmul %91, %91, %cst_67 {dimension_numbers = #tpu.dot_dimension_numbers<[1], [1], [0], [0], [0, 0, 1, 0], [], []>} : vector<16x16xf32>, vector<16x16xf32>, vector<16x16xf32> -> vector<16x16xf32>
    %93 = tpu.iota {dimensions = array<i32: 0>} : vector<16x16xi32>
    %94 = tpu.iota {dimensions = array<i32: 1>} : vector<16x16xi32>
    %95 = arith.cmpi eq, %93, %94 : vector<16x16xi32>
    %cst_68 = arith.constant -1.000000e+30 : f32
    %96 = vector.broadcast %cst_68 : f32 to vector<16x16xf32>
    %97 = arith.select %95, %96, %92 : vector<16x16xi1>, vector<16x16xf32>
    %cst_69 = arith.constant dense<0xFF800000> : vector<16xf32>
    %98 = vector.multi_reduction <maximumf>, %97, %cst_69 [1] : vector<16x16xf32> to vector<16xf32>
    %99 = vector.shape_cast %98 : vector<16xf32> to vector<16x1xf32>
    %100 = vector.broadcast %99 : vector<16x1xf32> to vector<16x16xf32>
    %101 = arith.subf %97, %100 : vector<16x16xf32>
    %102 = math.exp %101 : vector<16x16xf32>
    %cst_70 = arith.constant dense<0.000000e+00> : vector<16xf32>
    %103 = vector.multi_reduction <add>, %102, %cst_70 [1] : vector<16x16xf32> to vector<16xf32>
    %104 = vector.shape_cast %103 : vector<16xf32> to vector<16x1xf32>
    %105 = math.log %104 : vector<16x1xf32>
    %106 = arith.addf %105, %99 : vector<16x1xf32>
    %107 = vector.extract_strided_slice %91 {offsets = [0, 0], sizes = [8, 16], strides = [1, 1]} : vector<16x16xf32> to vector<8x16xf32>
    %108 = vector.extract_strided_slice %91 {offsets = [8, 0], sizes = [8, 16], strides = [1, 1]} : vector<16x16xf32> to vector<8x16xf32>
    %109 = arith.mulf %107, %108 : vector<8x16xf32>
    %cst_71 = arith.constant dense<0.000000e+00> : vector<8xf32>
    %110 = vector.multi_reduction <add>, %109, %cst_71 [1] : vector<8x16xf32> to vector<8xf32>
    %111 = vector.shape_cast %110 : vector<8xf32> to vector<8x1xf32>
    %cst_72 = arith.constant dense<0.000000e+00> : vector<1xf32>
    %112 = vector.multi_reduction <add>, %106, %cst_72 [0] : vector<16x1xf32> to vector<1xf32>
    %113 = vector.shape_cast %112 : vector<1xf32> to vector<1x1xf32>
    %cst_73 = arith.constant dense<0.000000e+00> : vector<1xf32>
    %114 = vector.multi_reduction <add>, %111, %cst_73 [0] : vector<8x1xf32> to vector<1xf32>
    %115 = vector.shape_cast %114 : vector<1xf32> to vector<1x1xf32>
    %cst_74 = arith.constant 2.000000e+00 : f32
    %116 = vector.broadcast %cst_74 : f32 to vector<1x1xf32>
    %117 = arith.mulf %116, %115 : vector<1x1xf32>
    %118 = arith.subf %113, %117 : vector<1x1xf32>
    %cst_75 = arith.constant 5.000000e-01 : f32
    %cst_76 = arith.constant 1.600000e+01 : f32
    %119 = arith.divf %cst_75, %cst_76 : f32
    %120 = vector.broadcast %119 : f32 to vector<1x1xf32>
    %121 = arith.mulf %120, %118 : vector<1x1xf32>
    %122 = tpu.iota {dimensions = array<i32: 1>} : vector<1x2xi32>
    %c0_i32 = arith.constant 0 : i32
    %123 = vector.broadcast %c0_i32 : i32 to vector<1x2xi32>
    %124 = arith.cmpi eq, %122, %123 : vector<1x2xi32>
    %125 = vector.shape_cast %78 : vector<1x1xf32> to vector<1x1xf32>
    %126 = vector.broadcast %125 : vector<1x1xf32> to vector<1x2xf32>
    %127 = vector.shape_cast %121 : vector<1x1xf32> to vector<1x1xf32>
    %128 = vector.broadcast %127 : vector<1x1xf32> to vector<1x2xf32>
    %129 = arith.select %124, %126, %128 : vector<1x2xi1>, vector<1x2xf32>
    %c0_77 = arith.constant 0 : index
    %c0_78 = arith.constant 0 : index
    %130 = vector.load %arg20[%c0_77, %c0_78] : memref<1x2xf32, #tpu.memory_space<vmem>>, vector<1x2xf32>
    tpu.vector_store %arg20[%c0_77, %c0_78], %129 {strides = array<i32>} : memref<1x2xf32, #tpu.memory_space<vmem>>, vector<1x2xf32>,
    return
  }
  func.func @transform_0(%arg0: i32) -> (i32, i32) {
    %c0_i32 = arith.constant 0 : i32
    %c0_i32_0 = arith.constant 0 : i32
    %c0_i32_1 = arith.constant 0 : i32
    return %c0_i32, %c0_i32_0 : i32, i32
  }
  func.func @transform_1(%arg0: i32) -> (i32, i32) {
    %c0_i32 = arith.constant 0 : i32
    %c0_i32_0 = arith.constant 0 : i32
    %c0_i32_1 = arith.constant 0 : i32
    return %c0_i32, %c0_i32_0 : i32, i32
  }
  func.func @transform_2(%arg0: i32) -> (i32, i32) {
    %c0_i32 = arith.constant 0 : i32
    %c0_i32_0 = arith.constant 0 : i32
    %c0_i32_1 = arith.constant 0 : i32
    return %c0_i32, %c0_i32_0 : i32, i32
  }
  func.func @transform_3(%arg0: i32) -> (i32, i32) {
    %c0_i32 = arith.constant 0 : i32
    %c0_i32_0 = arith.constant 0 : i32
    %c0_i32_1 = arith.constant 0 : i32
    return %c0_i32, %c0_i32_0 : i32, i32
  }
  func.func @transform_4(%arg0: i32) -> (i32, i32) {
    %c0_i32 = arith.constant 0 : i32
    %c0_i32_0 = arith.constant 0 : i32
    %c0_i32_1 = arith.constant 0 : i32
    return %c0_i32, %c0_i32_0 : i32, i32
  }
  func.func @transform_5(%arg0: i32) -> (i32, i32) {
    %c0_i32 = arith.constant 0 : i32
    %c0_i32_0 = arith.constant 0 : i32
    %c0_i32_1 = arith.constant 0 : i32
    return %c0_i32, %c0_i32_0 : i32, i32
  }
  func.func @transform_6(%arg0: i32) -> (i32, i32) {
    %c0_i32 = arith.constant 0 : i32
    %c0_i32_0 = arith.constant 0 : i32
    %c0_i32_1 = arith.constant 0 : i32
    return %c0_i32, %c0_i32_0 : i32, i32
  }
  func.func @transform_7(%arg0: i32) -> (i32, i32) {
    %c0_i32 = arith.constant 0 : i32
    %c0_i32_0 = arith.constant 0 : i32
    %c0_i32_1 = arith.constant 0 : i32
    return %c0_i32, %c0_i32_0 : i32, i32
  }
  func.func @transform_8(%arg0: i32) -> (i32, i32) {
    %c0_i32 = arith.constant 0 : i32
    %c0_i32_0 = arith.constant 0 : i32
    %c0_i32_1 = arith.constant 0 : i32
    return %c0_i32, %c0_i32_0 : i32, i32
  }
  func.func @transform_9(%arg0: i32) -> (i32, i32) {
    %c0_i32 = arith.constant 0 : i32
    %c0_i32_0 = arith.constant 0 : i32
    %c0_i32_1 = arith.constant 0 : i32
    return %c0_i32, %c0_i32_0 : i32, i32
  }
  func.func @transform_10(%arg0: i32) -> (i32, i32) {
    %c0_i32 = arith.constant 0 : i32
    %c0_i32_0 = arith.constant 0 : i32
    %c0_i32_1 = arith.constant 0 : i32
    return %c0_i32, %c0_i32_0 : i32, i32
  }
  func.func @transform_11(%arg0: i32) -> (i32, i32) {
    %c0_i32 = arith.constant 0 : i32
    %c0_i32_0 = arith.constant 0 : i32
    %c0_i32_1 = arith.constant 0 : i32
    return %c0_i32, %c0_i32_0 : i32, i32
  }
  func.func @transform_12(%arg0: i32) -> (i32, i32) {
    %c0_i32 = arith.constant 0 : i32
    %c0_i32_0 = arith.constant 0 : i32
    %c0_i32_1 = arith.constant 0 : i32
    return %c0_i32, %c0_i32_0 : i32, i32
  }
  func.func @transform_13(%arg0: i32) -> (i32, i32) {
    %c0_i32 = arith.constant 0 : i32
    %c0_i32_0 = arith.constant 0 : i32
    %c0_i32_1 = arith.constant 0 : i32
    return %c0_i32, %c0_i32_0 : i32, i32
  }
  func.func @transform_14(%arg0: i32) -> (i32, i32) {
    %c0_i32 = arith.constant 0 : i32
    %c0_i32_0 = arith.constant 0 : i32
    %c0_i32_1 = arith.constant 0 : i32
    return %c0_i32, %c0_i32_0 : i32, i32
  }
  func.func @transform_15(%arg0: i32) -> (i32, i32) {
    %c0_i32 = arith.constant 0 : i32
    %c0_i32_0 = arith.constant 0 : i32
    %c0_i32_1 = arith.constant 0 : i32
    return %c0_i32, %c0_i32_0 : i32, i32
  }
  func.func @transform_16(%arg0: i32) -> (i32, i32) {
    %c0_i32 = arith.constant 0 : i32
    %c0_i32_0 = arith.constant 0 : i32
    %c0_i32_1 = arith.constant 0 : i32
    return %c0_i32, %c0_i32_0 : i32, i32
  }
  func.func @transform_17(%arg0: i32) -> (i32, i32) {
    %c0_i32 = arith.constant 0 : i32
    %c0_i32_0 = arith.constant 0 : i32
    %c0_i32_1 = arith.constant 0 : i32
    return %c0_i32, %c0_i32_0 : i32, i32
  }
  func.func @transform_18(%arg0: i32) -> (i32, i32) {
    %c0_i32 = arith.constant 0 : i32
    %c0_i32_0 = arith.constant 0 : i32
    %c0_i32_1 = arith.constant 0 : i32
    return %c0_i32, %c0_i32_0 : i32, i32
  }
  func.func @transform_19(%arg0: i32) -> (i32, i32) {
    %c0_i32 = arith.constant 0 : i32
    %c0_i32_0 = arith.constant 0 : i32
    %c0_i32_1 = arith.constant 0 : i32
    return %c0_i32, %c0_i32_0 : i32, i32
  }
}

</mosaic_0001>

<bundles_post_ra>
// kernel: dcpml_forward.1
= control target key start
LH: loop header
LB: loop body
LE: loop exit
PB: predicated region body
PF: predicated region fallthrough
CT: control target
= control target key end

     0   :  { %s1633_s0 = inlined_call_operand.vmem [shape: f32[8,64], index: 0, kind: input, shape index: {}]   ;;  %s1634_s1 = inlined_call_operand.vmem [shape: f32[8,64], index: 1, kind: input, shape index: {}]   ;;  %s1635_s2 = inlined_call_operand.vmem [shape: f32[8,16], index: 2, kind: input, shape index: {}]   ;;  %s1636_s3 = inlined_call_operand.vmem [shape: f32[8,16], index: 3, kind: input, shape index: {}]   ;;  %s1637_s4 = inlined_call_operand.vmem [shape: f32[64,32], index: 4, kind: input, shape index: {}]   ;;  %s1638_s5 = inlined_call_operand.vmem [shape: f32[1,32], index: 5, kind: input, shape index: {}]   ;;  %s1639_s6 = inlined_call_operand.vmem [shape: f32[32,16], index: 6, kind: input, shape index: {}]   ;;  %s1640_s7 = inlined_call_operand.vmem [shape: f32[1,16], index: 7, kind: input, shape index: {}]   ;;  %s1641_s8 = inlined_call_operand.vmem [shape: f32[32,16], index: 8, kind: input, shape index: {}]   ;;  %s1642_s9 = inlined_call_operand.vmem [shape: f32[1,16], index: 9, kind: input, shape index: {}]   ;;  %s1643_s10 = inlined_call_operand.vmem [shape: f32[16,32], index: 10, kind: input, shape index: {}]   ;;  %s1644_s11 = inlined_call_operand.vmem [shape: f32[1,32], index: 11, kind: input, shape index: {}]   ;;  %s1645_s12 = inlined_call_operand.vmem [shape: f32[32,128], index: 12, kind: input, shape index: {}]   ;;  %s1646_s13 = inlined_call_operand.vmem [shape: f32[1,128], index: 13, kind: input, shape index: {}]   ;;  %s1647_s14 = inlined_call_operand.vmem [shape: f32[16,16], index: 14, kind: input, shape index: {}]   ;;  %s1648_s15 = inlined_call_operand.vmem [shape: f32[1,16], index: 15, kind: input, shape index: {}]   ;;  %s1649_s16 = inlined_call_operand.vmem [shape: f32[16,16], index: 16, kind: input, shape index: {}]   ;;  %s1650_s17 = inlined_call_operand.vmem [shape: f32[1,16], index: 17, kind: input, shape index: {}]   ;;  %s1651_s18 = inlined_call_operand.hbm [shape: f32[8,128], index: 18, kind: output, shape index: {0}]   ;;  %s1652_s19 = inlined_call_operand.vmem [shape: f32[1,2], index: 19, kind: output, shape index: {1}]  }
   0x1   :  { %1653 = sst [smem:[#allocation5_spill]] %s1633_s0 }
   0x2   :  { %1654 = sst [smem:[#allocation6_spill]] %s1634_s1 }
   0x3   :  { %1655 = sst [smem:[#allocation7_spill]] %s1635_s2 }
   0x4   :  { %1656 = sst [smem:[#allocation8_spill]] %s1636_s3 }
   0x5   :  { %v71_v0 = vld [vmem:[%s1637_s4 + $0x38] sm:$0xff]  ;;  %v1326_v1 = vmov 0.0   ;;  %v70_v2 = vld [vmem:[%s1637_s4 + $0x30] sm:$0xff]  ;;  %vm1327_vm0 = vmmov 0   ;;  %v69_v3 = vld [vmem:[%s1637_s4 + $0x28] sm:$0xff] }
   0x6   :  { %1158 = vmatprep.subr.mxu0 %v1326_v1  ;;  %1174 = vmatprep.mubr.msk.f32.mxu0 %vm1327_vm0, %v1326_v1 }
   0x7   :  { %1159 = vmatpush3.msra.mxu0 %v71_v0  ;;  %1177 = vmatprep.subr.mxu1 %v1326_v1 }
   0x8   :  { %1160 = vmatprep.subr.mxu0 %v1326_v1  ;;  %1185 = vmatprep.mubr.msk.f32.mxu1 %vm1327_vm0, %v1326_v1 }
   0x9   :  { %25 = vsyncpa [#allocation3], 0  ;;  %1161 = vmatpush3.msra.mxu0 %v70_v2  ;;  %v68_v4 = vld [vmem:[%s1637_s4 + $0x20] sm:$0xff]  ;;  %v67_v5 = vld [vmem:[%s1637_s4 + $0x18] sm:$0xff]  ;;  %s1657_s21 = sld [smem:[#allocation5_spill]]  ;;  %vm79_vm1 = vcmask 523264  }
   0xa   :  { %1162 = vmatprep.subr.mxu0 %v1326_v1  ;;  %v66_v6 = vld [vmem:[%s1637_s4 + $0x10] sm:$0xff]  ;;  %v65_v7 = vld [vmem:[%s1637_s4 + $0x8] sm:$0xff]  ;;  %v64_v8 = vld [vmem:[%s1637_s4] sm:$0xff]  ;;  %s1658_s22 = sld [smem:[#allocation6_spill]]  ;;  %vm165_vm2 = vcmask 261120   ;;  %vm558_vm3 = vcmask 130048  }
   0xb   :  { %1163 = vmatpush3.msra.mxu0 %v69_v3  ;;  %v157_v11 = vld [vmem:[%s1639_s6 + $0x18] sm:$0xff]  ;;  %v156_v12 = vld [vmem:[%s1639_s6 + $0x10] sm:$0xff]  ;;  %v155_v13 = vld [vmem:[%s1639_s6 + $0x8] sm:$0xff]  ;;  %s1659_s29 = sld [smem:[#allocation7_spill]] }
   0xc   :  { %1164 = vmatprep.subr.mxu0 %v1326_v1  ;;  %1178 = vmatpush3.msra.mxu1 %v157_v11  ;;  %v154_v14 = vld [vmem:[%s1639_s6] sm:$0xff]  ;;  %v242_v19 = vld [vmem:[%s1641_s8 + $0x18] sm:$0xff]  ;;  %v241_v23 = vld [vmem:[%s1641_s8 + $0x10] sm:$0xff] }
   0xd   :  { %1165 = vmatpush3.msra.mxu0 %v68_v4  ;;  %1179 = vmatprep.subr.mxu1 %v1326_v1  ;;  %v1077_v15 = vld [vmem:[%s1638_s5] ss:$0 sm:$0xff]  ;;  %v240_v25 = vld [vmem:[%s1641_s8 + $0x8] sm:$0xff]  ;;  %v636_v60 = vld [vmem:[%s1645_s12 + $0x18] sm:$0xff] }
   0xe   :  { %1166 = vmatprep.subr.mxu0 %v1326_v1  ;;  %1180 = vmatpush3.msra.mxu1 %v156_v12  ;;  %v239_v26 = vld [vmem:[%s1641_s8] sm:$0xff]  ;;  %v550_v28 = vld [vmem:[%s1643_s10 + $0x8] sm:$0xff]  ;;  %v635_v61 = vld [vmem:[%s1645_s12 + $0x10] sm:$0xff] }
   0xf   :  { %1167 = vmatpush3.msra.mxu0 %v67_v5  ;;  %v62_v9 = vld [vmem:[%s1657_s21] sm:$0xff]  ;;  %1181 = vmatprep.subr.mxu1 %v1326_v1  ;;  %v743_v30 = vld [vmem:[%s1647_s14 + $0x8] sm:$0xff] }
  0x10   :  { %1168 = vmatprep.subr.mxu0 %v1326_v1  ;;  %v1482_v10 = vld [vmem:[%s1658_s22] sm:$0xff]  ;;  %1182 = vmatpush3.msra.mxu1 %v155_v13  ;;  %v832_v58 = vld [vmem:[%s1649_s16 + $0x8] sm:$0xff] }
  0x11   :  { %1169 = vmatpush3.msra.mxu0 %v66_v6  ;;  %1183 = vmatprep.subr.mxu1 %v1326_v1  ;;  %v549_v29 = vld [vmem:[%s1643_s10] sm:$0xff]  ;;  %v634_v62 = vld [vmem:[%s1645_s12 + $0x8] sm:$0xff] }
  0x12   :  { %1170 = vmatprep.subr.mxu0 %v1326_v1  ;;  %1184 = vmatpush3.msra.mxu1 %v154_v14  ;;  %v1081_v35 = vld [vmem:[%s1642_s9] ss:$0 sm:$0xff]  ;;  %s1660_s9 = sld [smem:[#allocation8_spill]] }
  0x13   :  { %1171 = vmatpush3.msra.mxu0 %v65_v7  ;;  %1188 = vmatprep.subr.mxu1 %v1326_v1  ;;  %v537_v47 = vld [vmem:[%s1659_s29] sm:$0xff] }
  0x14   :  { %1172 = vmatprep.subr.mxu0 %v1326_v1  ;;  %v1079_v49 = vld [vmem:[%s1640_s7] ss:$0 sm:$0xff] }
  0x15   :  { %1173 = vmatpush3.msra.mxu0 %v64_v8  ;;  %v742_v56 = vld [vmem:[%s1647_s14] sm:$0xff] }
  0x16   :  { %1175 = vmatmul.mubr.msk.f32.vlgmr.msra.gmra.mxu0 %vm79_vm1, %v62_v9  ;;  %1199 = vmatprep.subr.mxu0 %v1326_v1  ;;  %v831_v59 = vld [vmem:[%s1649_s16] sm:$0xff] }
  0x17   :  { %1200 = vmatpush3.msra.mxu0 %v71_v0  ;;  %1215 = vmatprep.mubr.msk.f32.mxu0 %vm1327_vm0, %v1326_v1  ;;  %v633_v63 = vld [vmem:[%s1645_s12] sm:$0xff] }
  0x18   :  { %1201 = vmatprep.subr.mxu0 %v1326_v1  ;;  %v543_v48 = vld [vmem:[%s1660_s9] sm:$0xff] }
  0x19   :  { %1202 = vmatpush3.msra.mxu0 %v70_v2  ;;  %v1086_v0 = vld [vmem:[%s1644_s11] ss:$0 sm:$0xff] }
  0x1a   :  { %1203 = vmatprep.subr.mxu0 %v1326_v1 }
  0x1b   :  { %1204 = vmatpush3.msra.mxu0 %v69_v3 }
  0x1c   :  { %1205 = vmatprep.subr.mxu0 %v1326_v1 }
  0x1d   :  { %1206 = vmatpush3.msra.mxu0 %v68_v4 }
  0x1e   :  { %1207 = vmatprep.subr.mxu0 %v1326_v1 }
  0x1f   :  { %1208 = vmatpush3.msra.mxu0 %v67_v5  ;;  %v1090_v5 = vld [vmem:[%s1648_s15] ss:$0 sm:$0xff] }
  0x20   :  { %1209 = vmatprep.subr.mxu0 %v1326_v1 }
  0x21   :  { %1210 = vmatpush3.msra.mxu0 %v66_v6 }
  0x22   :  { %1211 = vmatprep.subr.mxu0 %v1326_v1 }
  0x23   :  { %1212 = vmatpush3.msra.mxu0 %v65_v7 }
  0x24   :  { %1213 = vmatprep.subr.mxu0 %v1326_v1 }
  0x25   :  { %1214 = vmatpush3.msra.mxu0 %v64_v8 }
  0x26   :  { %1216 = vmatmul.mubr.msk.f32.vlgmr.msra.gmra.mxu0 %vm79_vm1, %v1482_v10  ;;  %1240 = vmatprep.subr.mxu0 %v1326_v1 }
  0x27   :  { %1244 = vmatprep.mubr.msk.f32.mxu0 %vm1327_vm0, %v1326_v1  ;;  %1241 = vmatpush3.msra.mxu0 %v550_v28 }
  0x28   :  { %1242 = vmatprep.subr.mxu0 %v1326_v1 }
  0x29   :  { %1243 = vmatpush3.msra.mxu0 %v549_v29 }
  0x2a   :  { %1258 = vmatprep.subr.mxu0 %v743_v30 }
  0xd6   :  { %v149_v16 = vpop.f32.mrf.mxu0 }
  0xd7   :  { %v150_v17 = vadd.f32 %v1077_v15, %v149_v16 }
  0xd8   :  { %v1176_v18 = vpop.f32.mrf.mxu0 }
  0xd9   :  { %1282 = vtanh.f32 %v150_v17  ;;  %v1088_v18 = vld [vmem:[%s1646_s13] ss:$0 sm:$0xff]  ;;  %s1328_s13 = smov [#allocation2]  }
  0xe6   :  { %v1283_v20 = vpop.eup %1282  ;;  %v389_v21 = vpop.f32.mrf.mxu0 }
  0xe7   :  { %v390_v22 = vadd.f32 %v1077_v15, %v389_v21  ;;  %1186 = vmatmul.mubr.msk.f32.vlgmr.msra.gmra.mxu1 %vm165_vm2, %v1283_v20 }
  0xe8   :  { %1189 = vmatpush3.msra.mxu1 %v242_v19  ;;  %v1217_v24 = vpop.f32.mrf.mxu0  ;;  %1196 = vmatprep.mubr.msk.f32.mxu1 %vm1327_vm0, %v1326_v1 }
  0xe9   :  { %1284 = vtanh.f32 %v390_v22  ;;  %1190 = vmatprep.subr.mxu1 %v1326_v1 }
  0xea   :  { %1191 = vmatpush3.msra.mxu1 %v241_v23 }
  0xeb   :  { %1192 = vmatprep.subr.mxu1 %v1326_v1 }
  0xec   :  { %1193 = vmatpush3.msra.mxu1 %v240_v25 }
  0xed   :  { %1194 = vmatprep.subr.mxu1 %v1326_v1 }
  0xee   :  { %1195 = vmatpush3.msra.mxu1 %v239_v26 }
  0xef   :  { %1197 = vmatmul.mubr.msk.f32.vlgmr.msra.gmra.mxu1 %vm165_vm2, %v1283_v20  ;;  %1218 = vmatprep.subr.mxu1 %v1326_v1 }
  0xf0   :  { %1219 = vmatpush3.msra.mxu1 %v157_v11  ;;  %1226 = vmatprep.mubr.msk.f32.mxu1 %vm1327_vm0, %v1326_v1 }
  0xf1   :  { %1220 = vmatprep.subr.mxu1 %v1326_v1 }
  0xf2   :  { %1221 = vmatpush3.msra.mxu1 %v156_v12 }
  0xf3   :  { %1222 = vmatprep.subr.mxu1 %v1326_v1 }
  0xf4   :  { %1223 = vmatpush3.msra.mxu1 %v155_v13  ;;  %v1093_v13 = vld [vmem:[%s1650_s17] ss:$0 sm:$0xff]  ;;  %s1065_s17 = sshll.u32 %s1328_s13, 4  ;;  %s1066_s17 = int_to_ptr.vmem [resolvable:$true] %s1065_s17 }
  0xf5   :  { %1224 = vmatprep.subr.mxu1 %v1326_v1  ;;  %s1304_s0 = scalar_lea.vmem %s1066_s17, 128  ;;  %p1309_p1 = scmp.lt.s32.totalorder %s1066_s17, %s1066_s17 }
  0xf6   :  { %v1285_v27 = vpop.eup %1284  ;;  %1225 = vmatpush3.msra.mxu1 %v154_v14  ;;  %p1305_p0 = scmp.ne.s32.totalorder %s1066_s17, %s1304_s0  ;;  %p1310_p2 = scmp.lt.s32.totalorder %s1304_s0, %s1304_s0 }
  0xf7   :  { %1229 = vmatprep.subr.mxu1 %v1326_v1  ;;  %1227 = vmatmul.mubr.msk.f32.vlgmr.msra.gmra.mxu1 %vm165_vm2, %v1285_v27 }
  0xf8   :  { %1230 = vmatpush3.msra.mxu1 %v242_v19  ;;  %1237 = vmatprep.mubr.msk.f32.mxu1 %vm1327_vm0, %v1326_v1  ;;  %p1311_p3 = por %p1310_p2, %p1309_p1 }
  0xf9   :  { %1231 = vmatprep.subr.mxu1 %v1326_v1 }
  0xfa   :  { %1232 = vmatpush3.msra.mxu1 %v241_v23  ;;  %p1312_p4 = pnand %p1311_p3, %p1305_p0 }
  0xfb   :  { %1233 = vmatprep.subr.mxu1 %v1326_v1 }
  0xfc   :  { %1234 = vmatpush3.msra.mxu1 %v240_v25  ;;  %v1002_v25 = vlaneseq }
  0xfd   :  { %1235 = vmatprep.subr.mxu1 %v1326_v1 }
  0xfe   :  { %1236 = vmatpush3.msra.mxu1 %v239_v26  ;;  %v1615_v29 = vand.u32 127, %v1002_v25 }
  0xff   :  { %1238 = vmatmul.mubr.msk.f32.vlgmr.msra.gmra.mxu1 %vm165_vm2, %v1285_v27  ;;  %1247 = vmatprep.subr.mxu1 %v1326_v1  ;;  %v1003_v27 = vshrl.u32 %v1002_v25, 7 }
 0x100   :  { %1255 = vmatprep.mubr.msk.f32.mxu1 %vm1327_vm0, %v1326_v1  ;;  %1248 = vmatpush3.msra.mxu1 %v636_v60 }
 0x101   :  { %1249 = vmatprep.subr.mxu1 %v1326_v1  ;;  %v1004_v28 = vadd.s32 8, %v1003_v27  ;;  %vm1007_vm5 = vcmp.eq.s32.totalorder %v1003_v27, %v1615_v29 }
 0x102   :  { %1250 = vmatpush3.msra.mxu1 %v635_v61 }
 0x103   :  { %1251 = vmatprep.subr.mxu1 %v1326_v1  ;;  %vm1008_vm4 = vcmp.eq.s32.totalorder %v1004_v28, %v1615_v29 }
 0x104   :  { %1252 = vmatpush3.msra.mxu1 %v634_v62 }
 0x105   :  { %1253 = vmatprep.subr.mxu1 %v1326_v1 }
 0x106   :  { %1254 = vmatpush3.msra.mxu1 %v633_v63 }
 0x1a7   :  { %v235_v31 = vpop.f32.mrf.mxu1 }
 0x1a8   :  { %v236_v54 = vadd.f32 %v1079_v49, %v235_v31 }
 0x1a9   :  { %v1187_v32 = vpop.f32.mrf.mxu1 }
 0x1af   :  { %v316_v33 = vpop.f32.mrf.mxu1 }
 0x1b0   :  { %v317_v36 = vadd.f32 %v1081_v35, %v316_v33 }
 0x1b1   :  { %v1198_v34 = vpop.f32.mrf.mxu1 }
 0x1b2   :  { %v538_v39 = vmul.f32 0.5, %v317_v36 }
 0x1b4   :  { %v539_v40 = vmul.f32 1.442695, %v538_v39 }
 0x1b6   :  { %1286 = vpow2.f32 %v539_v40 }
 0x1b7   :  { %v463_v37 = vpop.f32.mrf.mxu1 }
 0x1b8   :  { %v464_v52 = vadd.f32 %v1079_v49, %v463_v37 }
 0x1b9   :  { %v1228_v38 = vpop.f32.mrf.mxu1 }
 0x1bf   :  { %v533_v41 = vpop.f32.mrf.mxu1 }
 0x1c0   :  { %v534_v42 = vadd.f32 %v1081_v35, %v533_v41 }
 0x1c1   :  { %v1239_v43 = vpop.f32.mrf.mxu1 }
 0x1c2   :  { %v544_v44 = vmul.f32 0.5, %v534_v42 }
 0x1c3   :  { %v1287_v46 = vpop.eup %1286 }
 0x1c4   :  { %v545_v45 = vmul.f32 1.442695, %v544_v44  ;;  %v541_v51 = vmul.f32 %v1287_v46, %v537_v47 }
 0x1c6   :  { %1288 = vpow2.f32 %v545_v45  ;;  %v542_v57 = vadd.f32 %v541_v51, %v236_v54 }
 0x1d3   :  { %v1289_v50 = vpop.eup %1288 }
 0x1d4   :  { %v547_v53 = vmul.f32 %v1289_v50, %v543_v48 }
 0x1d6   :  { %v548_v55 = vadd.f32 %v547_v53, %v464_v52 }
 0x1d8   :  { %1245 = vmatmul.mubr.msk.f32.vlgmr.msra.gmra.mxu0 %vm558_vm3, %v548_v55 }
 0x1d9   :  { %1259 = vmatpush3.msra.mxu0 %v743_v30  ;;  %1262 = vmatprep.mubr.msk.f32.mxu0 %vm558_vm3, %v542_v57 }
 0x1da   :  { %1260 = vmatprep.subr.mxu0 %v742_v56 }
 0x1db   :  { %1261 = vmatpush3.msra.mxu0 %v742_v56 }
 0x1dc   :  { %1263 = vmatmul.mubr.msk.f32.vlgmr.msra.gmra.mxu0 %vm558_vm3, %v548_v55  ;;  %1265 = vmatprep.subr.mxu0 %v832_v58 }
 0x1dd   :  { %1266 = vmatpush3.msra.mxu0 %v832_v58 }
 0x1de   :  { %1267 = vmatprep.subr.mxu0 %v831_v59 }
 0x1df   :  { %1268 = vmatpush3.msra.mxu0 %v831_v59 }
 0x298   :  { %v628_v2 = vpop.f32.mrf.mxu0 }
 0x299   :  { %v629_v3 = vadd.f32 %v1086_v0, %v628_v2 }
 0x29a   :  { %v1246_v4 = vpop.f32.mrf.mxu0 }
 0x29b   :  { %1290 = vtanh.f32 %v629_v3 }
 0x29c   :  { %v1264_v6 = vpop.f32.mrf.mxu0 }
 0x29d   :  { %v826_v7 = vadd.f32 %v1264_v6, %v1090_v5 }
 0x29e   :  { %v820_v8 = vpop.f32.mrf.mxu0 }
 0x29f   :  { %v821_v9 = vadd.f32 %v1090_v5, %v820_v8  ;;  %v830_v12 = vmax.f32 %v826_v7, 0.0 }
 0x2a1   :  { %v829_v11 = vmax.f32 %v821_v9, 0.0 }
 0x2a3   :  { %1269 = vmatprep.mubr.msk.f32.mxu0 %vm558_vm3, %v829_v11 }
 0x2a4   :  { %1270 = vmatmul.mubr.msk.f32.vlgmr.msra.gmra.mxu0 %vm558_vm3, %v830_v12 }
 0x2a8   :  { %v1291_v1 = vpop.eup %1290 }
 0x2a9   :  { %1256 = vmatmul.mubr.msk.f32.vlgmr.msra.gmra.mxu1 %vm165_vm2, %v1291_v1 }
 0x364   :  { %v1271_v14 = vpop.f32.mrf.mxu0 }
 0x365   :  { %v918_v15 = vadd.f32 %v1271_v14, %v1093_v13 }
 0x366   :  { %v912_v16 = vpop.f32.mrf.mxu0 }
 0x367   :  { %v913_v17 = vadd.f32 %v1093_v13, %v912_v16  ;;  %1272 = vmatprep.subr.msk.mxu1 %vm558_vm3, %v918_v15 }
 0x368   :  { %1273 = vmatpush3.xpose.msk.msra.mxu1 %vm558_vm3, %v918_v15 }
 0x369   :  { %v713_v19 = vpop.f32.mrf.mxu1  ;;  %1274 = vmatprep.subr.msk.mxu1 %vm558_vm3, %v913_v17  ;;  %1276 = vmatprep.mubr.msk.f32.mxu1 %vm558_vm3, %v913_v17  ;;  %v1035_v20 = vmul.f32 %v918_v15, %v913_v17 }
 0x36a   :  { %v714_v21 = vadd.f32 %v1088_v18, %v713_v19 }
 0x36b   :  { %v1257_v22 = vpop.f32.mrf.mxu1  ;;  %v1036_v52 = vsel %vm558_vm3, %v1035_v20, 0.0 }
 0x36c   :  { %717 = vst [vmem:[#allocation2] sm:$0xff] %v714_v21  ;;  %718 = vmax.xlane.f32.xlu0 %v714_v21  ;;  %1275 = vmatpush3.xpose.msk.msra.mxu1 %vm558_vm3, %v913_v17 }
 0x36f   :  { %1277 = vmatmul.mubr.msk.f32.vlgmr.msra.gmra.mxu1 %vm558_vm3, %v918_v15 }
 0x3f5   :  { %v719_v23 = vpop.xlane.xlu0 %718 }
 0x3f6   :  { %v720_v24 = vsub.f32 %v714_v21, %v719_v23 }
 0x3f8   :  { %v721_v26 = vmul.f32 1.442695, %v720_v24 }
 0x3fa   :  { %1292 = vpow2.f32 %v721_v26 }
 0x407   :  { %v1293_v36 = vpop.eup %1292 }
 0x42f   :  { %v1278_v30 = vpop.f32.mrf.mxu1 }
 0x430   :  { %v1010_v31 = vsel %vm1008_vm4, -1e+30, %v1278_v30 }
 0x431   :  { %v993_v32 = vpop.f32.mrf.mxu1  ;;  %v1014_v33 = vsel %vm558_vm3, %v1010_v31, -inf }
 0x432   :  { %v1009_v34 = vsel %vm1007_vm5, -1e+30, %v993_v32  ;;  %1015 = vmax.xlane.f32.xlu1 %v1014_v33 }
 0x433   :  { %v1011_v35 = vsel %vm558_vm3, %v1009_v34, -inf }
 0x434   :  { %1012 = vmax.xlane.f32.xlu0 %v1011_v35 }
 0x436   :  { %723 = vadd.xlane.f32.xlu1 %v1293_v36 }
 0x4bb   :  { %v1016_v37 = vpop.xlane.xlu1 %1015 }
 0x4bc   :  { %v1018_v38 = vsub.f32 %v1010_v31, %v1016_v37 }
 0x4bd   :  { %v1013_v39 = vpop.xlane.xlu0 %1012 }
 0x4be   :  { %v1021_v40 = vmul.f32 1.442695, %v1018_v38  ;;  %v1017_v41 = vsub.f32 %v1009_v34, %v1013_v39 }
 0x4bf   :  { %v724_v42 = vpop.xlane.xlu1 %723 }
 0x4c0   :  { %1294 = vpow2.f32 %v1021_v40  ;;  %v1019_v43 = vmul.f32 1.442695, %v1017_v41 }
 0x4c1   :  { %1296 = vlog2.f32 %v724_v42 }
 0x4c2   :  { %1298 = vpow2.f32 %v1019_v43 }
 0x4cd   :  { %v1295_v44 = vpop.eup %1294 }
 0x4ce   :  { %v1297_v45 = vpop.eup %1296  ;;  %v1026_v46 = vsel %vm558_vm3, %v1295_v44, 0.0 }
 0x4cf   :  { %v1299_v47 = vpop.eup %1298  ;;  %v726_v48 = vmul.f32 0.6931472, %v1297_v45  ;;  %1027 = vadd.xlane.f32.xlu1 %v1026_v46 }
 0x4d0   :  { %v1023_v49 = vsel %vm558_vm3, %v1299_v47, 0.0 }
 0x4d1   :  { %v727_v50 = vadd.f32 %v726_v48, %v719_v23  ;;  %1024 = vadd.xlane.f32.xlu0 %v1023_v49 }
 0x4d3   :  { %v728_v51 = vsub.f32 %v714_v21, %v727_v50 }
 0x4d5   :  { %1037 = vadd.xlane.f32.xlu0 %v1036_v52  ;;  %v729_v53 = vmul.f32 %v728_v51, %v1482_v10 }
 0x4d7   :  { %v730_v54 = vsel %vm79_vm1, %v729_v53, 0.0 }
 0x4d8   :  { %731 = vadd.xlane.f32.xlu1 %v730_v54 }
 0x4d9   :  { %1315 = shalt.err (!%p1312_p4)
}
 0x4da   :  { %1068 = dma.vmem_to_hbm [thread:$0]  %s1066_s17, 128, %s1651_s18, [#allocation3]   ;;  %vm1055_vm6 = vcmp.eq.s32.totalorder %v1615_v29, 0  ;;  %vm1057_vm7 = vcmask 8192  }
 0x558   :  { %v1028_v55 = vpop.xlane.xlu1 %1027 }
 0x559   :  { %1300 = vlog2.f32 %v1028_v55 }
 0x55a   :  { %v1025_v10 = vpop.xlane.xlu0 %1024 }
 0x55b   :  { %1302 = vlog2.f32 %v1025_v10 }
 0x55e   :  { %v1038_v56 = vpop.xlane.xlu0 %1037 }
 0x55f   :  { %v1046_v57 = vrot.slane %v1038_v56, 4 }
 0x561   :  { %v732_v58 = vpop.xlane.xlu1 %731  ;;  %v1047_v60 = vadd.f32 %v1046_v57, %v1038_v56 }
 0x562   :  { %v733_v59 = vrot.slane %v732_v58, 4 }
 0x563   :  { %v1048_v3 = vrot.slane %v1047_v60, 2 }
 0x564   :  { %v734_v61 = vadd.f32 %v733_v59, %v732_v58 }
 0x565   :  { %v1049_v8 = vadd.f32 %v1048_v3, %v1047_v60 }
 0x566   :  { %v1301_v62 = vpop.eup %1300  ;;  %v735_v4 = vrot.slane %v734_v61, 2 }
 0x567   :  { %v1032_v63 = vmul.f32 0.6931472, %v1301_v62  ;;  %v1050_v1 = vrot.slane %v1049_v8, 1 }
 0x568   :  { %v1303_v0 = vpop.eup %1302  ;;  %v736_v9 = vadd.f32 %v735_v4, %v734_v61 }
 0x569   :  { %v1030_v2 = vmul.f32 0.6931472, %v1303_v0  ;;  %v1034_v5 = vadd.f32 %v1032_v63, %v1016_v37  ;;  %v1051_v16 = vadd.f32 %v1050_v1, %v1049_v8 }
 0x56a   :  { %v737_v13 = vrot.slane %v736_v9, 1 }
 0x56b   :  { %v1033_v6 = vadd.f32 %v1030_v2, %v1013_v39  ;;  %v1052_v20 = vmul.f32 2.0, %v1051_v16 }
 0x56c   :  { %v738_v17 = vadd.f32 %v737_v13, %v736_v9 }
 0x56d   :  { %v1039_v7 = vadd.f32 %v1034_v5, %v1033_v6 }
 0x56e   :  { %v739_v21 = vsub.f32 0.0, %v738_v17 }
 0x56f   :  { %v1040_v11 = vrot.slane %v1039_v7, 4 }
 0x570   :  { %v741_v24 = vmul.f32 0.125, %v739_v21 }
 0x571   :  { %v1041_v12 = vadd.f32 %v1040_v11, %v1039_v7 }
 0x573   :  { %v1042_v14 = vrot.slane %v1041_v12, 2 }
 0x575   :  { %v1043_v15 = vadd.f32 %v1042_v14, %v1041_v12 }
 0x577   :  { %v1044_v18 = vrot.slane %v1043_v15, 1 }
 0x579   :  { %v1045_v19 = vadd.f32 %v1044_v18, %v1043_v15 }
 0x57b   :  { %v1053_v22 = vsub.f32 %v1045_v19, %v1052_v20 }
 0x57d   :  { %v1054_v23 = vmul.f32 0.03125, %v1053_v22 }
 0x57f   :  { %v1056_v25 = vsel %vm1055_vm6, %v741_v24, %v1054_v23 }
 0x580   :  { %1058 = vst.msk [vmem:[%s1652_s19] sm:$0x1] %vm1057_vm7, %v1056_v25 }
 0x581   :  { %1324 = dma.done.wait [#allocation3], 128  }
 0x582   :  { %1325 = vsyncadd [#allocation3], 4294967168 }
 0x583   :  { %1076 = vsyncpa [#allocation3], 1 }

</bundles_post_ra>
